<compile_context>
chip_gen: v6e
topology: v6e:2x2x1
jax: 0.10.0
libtpu: 0.0.40
codegen_flags: <defaults>
</compile_context>

<pallas_src>
import jax
import jax.numpy as jnp
import numpy as np
from jax import lax
from jax.experimental import pallas as pl
from jax.experimental.pallas import tpu as pltpu


def _cdiv(a, b):
    return -(-a // b)


def _round_up(n, m):
    return _cdiv(n, m) * m


def _choose_tile(batch, n):
    """Largest lane tile (multiple of 128, <= 2048) whose double-buffered streams
    plus scratch fit comfortably in scoped VMEM on all TPU generations."""
    n128 = _round_up(n, 128)
    # Pass-2 worst case bytes per lane column:
    #   x,y f32 double-buffered (16*B) + i8 station mask double-buffered (2*B)
    #   + f32 SSE scratch (4*B)  ~= 22*B ; use 24*B for margin.
    budget = 12 * 1024 * 1024
    fit = max(128, (budget // (24 * max(batch, 1))) // 128 * 128)
    return int(min(2048, fit, n128))


def _make_minmax_kernel(tile, n_valid_cols, chunk_tiles):
    def kernel(m_ref, ns_ref, y_ref, min_out, max_out, min_acc, max_acc):
        c = pl.program_id(0)   # parallel chunk
        j = pl.program_id(1)   # streaming/reduction step
        nt = pl.num_programs(1)

        @pl.when(j == 0)
        def _():
            min_acc[...] = jnp.full_like(min_acc, jnp.inf)
            max_acc[...] = jnp.full_like(max_acc, -jnp.inf)

        # valid = (mask_2d == 1) & (station == 0); masks arrive as {0,1} int8.
        vf = m_ref[...].astype(jnp.float32) * ns_ref[...].astype(jnp.float32)
        ym = y_ref[...] * vf  # invalid positions contribute 0 (reference semantics)

        # Exclude wrapper padding columns from the global min/max.
        col0 = (c * chunk_tiles + j) * tile
        col = col0 + lax.broadcasted_iota(jnp.int32, ym.shape, 1)
        inb = col < n_valid_cols
        min_acc[...] = jnp.minimum(min_acc[...], jnp.where(inb, ym, jnp.inf))
        max_acc[...] = jnp.maximum(max_acc[...], jnp.where(inb, ym, -jnp.inf))

        @pl.when(j == nt - 1)
        def _():
            # Single cross-lane reduce per chunk, epilogue only.
            min_out[0] = jnp.min(min_acc[...], axis=1, keepdims=True)
            max_out[0] = jnp.max(max_acc[...], axis=1, keepdims=True)

    return kernel


def _make_sse_kernel():
    def kernel(rng_ref, m_ref, ns_ref, x_ref, y_ref, sse_out, sse_acc):
        j = pl.program_id(1)
        nt = pl.num_programs(1)

        @pl.when(j == 0)
        def _():
            sse_acc[...] = jnp.zeros_like(sse_acc)

        mn = rng_ref[0]
        mx = rng_ref[1]
        vf = m_ref[...].astype(jnp.float32) * ns_ref[...].astype(jnp.float32)
        # torchmetrics clamps both preds and target to [min, max].
        xm = jnp.clip(x_ref[...] * vf, mn, mx)
        ym = jnp.clip(y_ref[...] * vf, mn, mx)
        d = xm - ym            # padding columns: both sides are clip(0) -> d == 0
        sse_acc[...] += d * d  # pure VPU accumulation in the hot loop

        @pl.when(j == nt - 1)
        def _():
            sse_out[0] = jnp.sum(sse_acc[...], axis=1, keepdims=True)

    return kernel


def masked_psnr(x, y, station_mask, mask_2d, reduction="elementwise_mean"):
    """x, y, station_mask: [B, C, H, W]; mask_2d: [H, W] (C == 1 in the module)."""
    B, C, H, W = x.shape
    N = C * H * W

    tile = _choose_tile(B, N)
    num_tiles = _cdiv(N, tile)
    nc = 2 if num_tiles >= 2 else 1            # parallel chunks (one per v7x TensorCore)
    chunk_tiles = _cdiv(num_tiles, nc)
    n_pad = nc * chunk_tiles * tile

    xf = x.reshape(B, N).astype(jnp.float32)
    yf = y.reshape(B, N).astype(jnp.float32)
    # Narrow mask streams: int8 over HBM, widened in-VMEM inside the kernels.
    m_i8 = (jnp.broadcast_to(mask_2d.reshape(1, 1, H, W), (1, C, H, W))
            .reshape(1, N) == 1).astype(jnp.int8)
    ns_i8 = (station_mask.reshape(B, N) == 0).astype(jnp.int8)

    pad = n_pad - N
    if pad:
        xf = jnp.pad(xf, ((0, 0), (0, pad)))
        yf = jnp.pad(yf, ((0, 0), (0, pad)))
        m_i8 = jnp.pad(m_i8, ((0, 0), (0, pad)))    # padded cols look "outside region"
        ns_i8 = jnp.pad(ns_i8, ((0, 0), (0, pad)))

    col_map = lambda c, j: (0, c * chunk_tiles + j)
    part_map = lambda c, j: (c, 0, 0)
    m_spec = pl.BlockSpec((1, tile), col_map)
    ns_spec = pl.BlockSpec((B, tile), col_map)
    f32_spec = pl.BlockSpec((B, tile), col_map)
    part_spec = pl.BlockSpec((1, B, 1), part_map)
    cparams = pltpu.CompilerParams(
        dimension_semantics=("parallel", "arbitrary"),
        vmem_limit_bytes=32 * 1024 * 1024,
    )

    # ---- Pass 1: global min / max of the masked target ----
    min_part, max_part = pl.pallas_call(
        _make_minmax_kernel(tile, N, chunk_tiles),
        grid=(nc, chunk_tiles),
        in_specs=[m_spec, ns_spec, f32_spec],
        out_specs=(part_spec, part_spec),
        out_shape=(
            jax.ShapeDtypeStruct((nc, B, 1), jnp.float32),
            jax.ShapeDtypeStruct((nc, B, 1), jnp.float32),
        ),
        scratch_shapes=[
            pltpu.VMEM((B, tile), jnp.float32),
            pltpu.VMEM((B, tile), jnp.float32),
        ],
        compiler_params=cparams,
    )(m_i8, ns_i8, yf)

    mn = jnp.min(min_part)
    mx = jnp.max(max_part)
    rng = jnp.stack([mn, mx])                  # (2,) f32, read from SMEM in pass 2

    # ---- Pass 2: per-sample SSE of the clamped, masked tensors ----
    sse_part = pl.pallas_call(
        _make_sse_kernel(),
        grid=(nc, chunk_tiles),
        in_specs=[
            pl.BlockSpec(memory_space=pltpu.MemorySpace.SMEM),
            m_spec, ns_spec, f32_spec, f32_spec,
        ],
        out_specs=part_spec,
        out_shape=jax.ShapeDtypeStruct((nc, B, 1), jnp.float32),
        scratch_shapes=[pltpu.VMEM((B, tile), jnp.float32)],
        compiler_params=cparams,
    )(rng, m_i8, ns_i8, xf, yf)

    # O(B) finalize in the wrapper (per review: chunk combine + log10 + batch mean
    # cost nothing in XLA and keep the kernels pure streaming reductions).
    sse = jnp.sum(sse_part, axis=0)[:, 0]                       # (B,)
    data_range = mx - mn
    mse = sse / jnp.float32(N)
    psnr = (2.0 * jnp.log(data_range) - jnp.log(mse)) * (10.0 / jnp.log(jnp.float32(10.0)))
    if reduction == "elementwise_mean":
        return jnp.mean(psnr)
    return psnr


def masked_psnr_reference(x, y, station_mask, mask_2d, reduction="elementwise_mean"):
    """Pure-JAX reference mirroring the PyTorch/torchmetrics forward."""
    valid = jnp.logical_and(mask_2d[None, None, :, :] == 1, station_mask == 0)
    xm = x * valid
    ym = y * valid
    mn = jnp.min(ym)
    mx = jnp.max(ym)
    xc = jnp.clip(xm, mn, mx)
    yc = jnp.clip(ym, mn, mx)
    sse = jnp.sum((xc - yc) ** 2, axis=(1, 2, 3))
    n = x.shape[1] * x.shape[2] * x.shape[3]
    dr = mx - mn
    psnr = (2.0 * jnp.log(dr) - jnp.log(sse / n)) * (10.0 / jnp.log(10.0))
    if reduction == "elementwise_mean":
        return jnp.mean(psnr)
    return psnr


if __name__ == "__main__":
    key = jax.random.PRNGKey(0)

    # Case 1: module-sized toy input (single tile, nc=1 path).
    B, C, H, W = 2, 1, 16, 16
    kx, ky, ks = jax.random.split(key, 3)
    mask_2d = jnp.zeros((H, W), jnp.float32).at[2:H - 2, 2:W - 2].set(1.0)
    x = jax.random.normal(kx, (B, C, H, W), jnp.float32)
    y = 2.0 * jax.random.normal(ky, (B, C, H, W), jnp.float32) + 0.5
    station_mask = jax.random.bernoulli(ks, 0.1, (B, C, H, W)).astype(jnp.float32)

    out_mean = jax.block_until_ready(masked_psnr(x, y, station_mask, mask_2d, "elementwise_mean"))
    out_none = jax.block_until_ready(masked_psnr(x, y, station_mask, mask_2d, "none"))
    ref_mean = jax.block_until_ready(masked_psnr_reference(x, y, station_mask, mask_2d, "elementwise_mean"))
    ref_none = jax.block_until_ready(masked_psnr_reference(x, y, station_mask, mask_2d, "none"))
    np.testing.assert_allclose(np.asarray(out_mean), np.asarray(ref_mean), rtol=1e-5, atol=1e-5)
    np.testing.assert_allclose(np.asarray(out_none), np.asarray(ref_none), rtol=1e-5, atol=1e-5)

    # Case 2: exercises the tiled/padded multi-chunk path (2 chunks x 2 steps + padding).
    B2, H2, W2 = 3, 80, 80
    k2x, k2y, k2s = jax.random.split(jax.random.PRNGKey(1), 3)
    mask2 = jnp.zeros((H2, W2), jnp.float32).at[5:H2 - 5, 5:W2 - 5].set(1.0)
    x2 = jax.random.normal(k2x, (B2, 1, H2, W2), jnp.float32)
    y2 = 1.5 * jax.random.normal(k2y, (B2, 1, H2, W2), jnp.float32) - 0.25
    sm2 = jax.random.bernoulli(k2s, 0.05, (B2, 1, H2, W2)).astype(jnp.float32)

    out2 = jax.block_until_ready(masked_psnr(x2, y2, sm2, mask2, "none"))
    ref2 = jax.block_until_ready(masked_psnr_reference(x2, y2, sm2, mask2, "none"))
    np.testing.assert_allclose(np.asarray(out2), np.asarray(ref2), rtol=1e-5, atol=1e-5)

    print("KERNEL_OK")
</pallas_src>

<mosaic_0001>
module attributes {stable_mosaic.version = 11 : i64} {
  func.func @kernel(%arg0: i32, %arg1: i32, %arg2: memref<1x256xi8, #tpu.memory_space<vmem>>, %arg3: memref<2x256xi8, #tpu.memory_space<vmem>>, %arg4: memref<2x256xf32, #tpu.memory_space<vmem>>, %arg5: memref<1x2x1xf32, #tpu.memory_space<vmem>>, %arg6: memref<1x2x1xf32, #tpu.memory_space<vmem>>, %arg7: memref<2x256xf32, #tpu.memory_space<vmem>>, %arg8: memref<2x256xf32, #tpu.memory_space<vmem>>) attributes {dimension_semantics = [#tpu.dimension_semantics<parallel>, #tpu.dimension_semantics<arbitrary>], iteration_bounds = array<i64: 1, 1>, scalar_prefetch = 0 : i64, scratch_operands = 2 : i64, tpu.core_type = #tpu.core_type<tc>, window_params = [{transform_indices = @transform_0, window_bounds = array<i64: 1, 256>}, {transform_indices = @transform_1, window_bounds = array<i64: 2, 256>}, {transform_indices = @transform_2, window_bounds = array<i64: 2, 256>}, {transform_indices = @transform_3, window_bounds = array<i64: 1, 2, 1>}, {transform_indices = @transform_4, window_bounds = array<i64: 1, 2, 1>}]} {
    %c0_i32 = arith.constant 0 : i32
    %0 = arith.cmpi eq, %arg1, %c0_i32 : i32
    %1 = arith.extui %0 : i1 to i32
    %c0_i32_0 = arith.constant 0 : i32
    %2 = arith.cmpi ne, %1, %c0_i32_0 : i32
    scf.if %2 {
      %cst_18 = arith.constant 0x7F800000 : f32
      %32 = vector.broadcast %cst_18 : f32 to vector<2x256xf32>
      %c0_19 = arith.constant 0 : index
      %c0_20 = arith.constant 0 : index
      %33 = vector.load %arg7[%c0_19, %c0_20] : memref<2x256xf32, #tpu.memory_space<vmem>>, vector<2x256xf32>
      tpu.vector_store %arg7[%c0_19, %c0_20], %32 {strides = array<i32>} : memref<2x256xf32, #tpu.memory_space<vmem>>, vector<2x256xf32>,
      %cst_21 = arith.constant 0xFF800000 : f32
      %34 = vector.broadcast %cst_21 : f32 to vector<2x256xf32>
      %c0_22 = arith.constant 0 : index
      %c0_23 = arith.constant 0 : index
      %35 = vector.load %arg8[%c0_22, %c0_23] : memref<2x256xf32, #tpu.memory_space<vmem>>, vector<2x256xf32>
      tpu.vector_store %arg8[%c0_22, %c0_23], %34 {strides = array<i32>} : memref<2x256xf32, #tpu.memory_space<vmem>>, vector<2x256xf32>,
    } else {
    }
    %c0 = arith.constant 0 : index
    %c0_1 = arith.constant 0 : index
    %3 = vector.load %arg2[%c0, %c0_1] : memref<1x256xi8, #tpu.memory_space<vmem>>, vector<1x256xi8>
    %4 = arith.sitofp %3 : vector<1x256xi8> to vector<1x256xf32>
    %c0_2 = arith.constant 0 : index
    %c0_3 = arith.constant 0 : index
    %5 = vector.load %arg3[%c0_2, %c0_3] : memref<2x256xi8, #tpu.memory_space<vmem>>, vector<2x256xi8>
    %6 = arith.sitofp %5 : vector<2x256xi8> to vector<2x256xf32>
    %7 = vector.broadcast %4 : vector<1x256xf32> to vector<2x256xf32>
    %8 = arith.mulf %7, %6 : vector<2x256xf32>
    %c0_4 = arith.constant 0 : index
    %c0_5 = arith.constant 0 : index
    %9 = vector.load %arg4[%c0_4, %c0_5] : memref<2x256xf32, #tpu.memory_space<vmem>>, vector<2x256xf32>
    %10 = arith.mulf %9, %8 : vector<2x256xf32>
    %c1_i32 = arith.constant 1 : i32
    %11 = arith.muli %arg0, %c1_i32 : i32
    %12 = arith.addi %11, %arg1 : i32
    %c256_i32 = arith.constant 256 : i32
    %13 = arith.muli %12, %c256_i32 : i32
    %14 = tpu.iota {dimensions = array<i32: 1>} : vector<2x256xi32>
    %15 = vector.broadcast %13 : i32 to vector<2x256xi32>
    %16 = arith.addi %15, %14 : vector<2x256xi32>
    %c256_i32_6 = arith.constant 256 : i32
    %17 = vector.broadcast %c256_i32_6 : i32 to vector<2x256xi32>
    %18 = arith.cmpi slt, %16, %17 : vector<2x256xi32>
    %c0_7 = arith.constant 0 : index
    %c0_8 = arith.constant 0 : index
    %19 = vector.load %arg7[%c0_7, %c0_8] : memref<2x256xf32, #tpu.memory_space<vmem>>, vector<2x256xf32>
    %cst = arith.constant 0x7F800000 : f32
    %20 = vector.broadcast %cst : f32 to vector<2x256xf32>
    %21 = arith.select %18, %10, %20 : vector<2x256xi1>, vector<2x256xf32>
    %22 = arith.minimumf %19, %21 : vector<2x256xf32>
    %c0_9 = arith.constant 0 : index
    %c0_10 = arith.constant 0 : index
    %23 = vector.load %arg7[%c0_9, %c0_10] : memref<2x256xf32, #tpu.memory_space<vmem>>, vector<2x256xf32>
    tpu.vector_store %arg7[%c0_9, %c0_10], %22 {strides = array<i32>} : memref<2x256xf32, #tpu.memory_space<vmem>>, vector<2x256xf32>,
    %c0_11 = arith.constant 0 : index
    %c0_12 = arith.constant 0 : index
    %24 = vector.load %arg8[%c0_11, %c0_12] : memref<2x256xf32, #tpu.memory_space<vmem>>, vector<2x256xf32>
    %cst_13 = arith.constant 0xFF800000 : f32
    %25 = vector.broadcast %cst_13 : f32 to vector<2x256xf32>
    %26 = arith.select %18, %10, %25 : vector<2x256xi1>, vector<2x256xf32>
    %27 = arith.maximumf %24, %26 : vector<2x256xf32>
    %c0_14 = arith.constant 0 : index
    %c0_15 = arith.constant 0 : index
    %28 = vector.load %arg8[%c0_14, %c0_15] : memref<2x256xf32, #tpu.memory_space<vmem>>, vector<2x256xf32>
    tpu.vector_store %arg8[%c0_14, %c0_15], %27 {strides = array<i32>} : memref<2x256xf32, #tpu.memory_space<vmem>>, vector<2x256xf32>,
    %c0_i32_16 = arith.constant 0 : i32
    %29 = arith.cmpi eq, %arg1, %c0_i32_16 : i32
    %30 = arith.extui %29 : i1 to i32
    %c0_i32_17 = arith.constant 0 : i32
    %31 = arith.cmpi ne, %30, %c0_i32_17 : i32
    scf.if %31 {
      %c0_18 = arith.constant 0 : index
      %c0_19 = arith.constant 0 : index
      %32 = vector.load %arg7[%c0_18, %c0_19] : memref<2x256xf32, #tpu.memory_space<vmem>>, vector<2x256xf32>
      %cst_20 = arith.constant dense<0x7F800000> : vector<2xf32>
      %33 = vector.multi_reduction <minimumf>, %32, %cst_20 [1] : vector<2x256xf32> to vector<2xf32>
      %34 = vector.shape_cast %33 : vector<2xf32> to vector<2x1xf32>
      %c0_21 = arith.constant 0 : index
      %c0_22 = arith.constant 0 : index
      %c0_23 = arith.constant 0 : index
      %35 = vector.load %arg5[%c0_21, %c0_22, %c0_23] : memref<1x2x1xf32, #tpu.memory_space<vmem>>, vector<1x2x1xf32>
      %36 = vector.shape_cast %35 : vector<1x2x1xf32> to vector<2x1xf32>
      %37 = vector.shape_cast %34 : vector<2x1xf32> to vector<1x2x1xf32>
      tpu.vector_store %arg5[%c0_21, %c0_22, %c0_23], %37 {strides = array<i32>} : memref<1x2x1xf32, #tpu.memory_space<vmem>>, vector<1x2x1xf32>,
      %c0_24 = arith.constant 0 : index
      %c0_25 = arith.constant 0 : index
      %38 = vector.load %arg8[%c0_24, %c0_25] : memref<2x256xf32, #tpu.memory_space<vmem>>, vector<2x256xf32>
      %cst_26 = arith.constant dense<0xFF800000> : vector<2xf32>
      %39 = vector.multi_reduction <maximumf>, %38, %cst_26 [1] : vector<2x256xf32> to vector<2xf32>
      %40 = vector.shape_cast %39 : vector<2xf32> to vector<2x1xf32>
      %c0_27 = arith.constant 0 : index
      %c0_28 = arith.constant 0 : index
      %c0_29 = arith.constant 0 : index
      %41 = vector.load %arg6[%c0_27, %c0_28, %c0_29] : memref<1x2x1xf32, #tpu.memory_space<vmem>>, vector<1x2x1xf32>
      %42 = vector.shape_cast %41 : vector<1x2x1xf32> to vector<2x1xf32>
      %43 = vector.shape_cast %40 : vector<2x1xf32> to vector<1x2x1xf32>
      tpu.vector_store %arg6[%c0_27, %c0_28, %c0_29], %43 {strides = array<i32>} : memref<1x2x1xf32, #tpu.memory_space<vmem>>, vector<1x2x1xf32>,
    } else {
    }
    return
  }
  func.func @transform_0(%arg0: i32, %arg1: i32) -> (i32, i32) {
    %c1_i32 = arith.constant 1 : i32
    %0 = arith.muli %arg0, %c1_i32 : i32
    %1 = arith.addi %0, %arg1 : i32
    %c0_i32 = arith.constant 0 : i32
    %c0_i32_0 = arith.constant 0 : i32
    return %c0_i32, %1 : i32, i32
  }
  func.func @transform_1(%arg0: i32, %arg1: i32) -> (i32, i32) {
    %c1_i32 = arith.constant 1 : i32
    %0 = arith.muli %arg0, %c1_i32 : i32
    %1 = arith.addi %0, %arg1 : i32
    %c0_i32 = arith.constant 0 : i32
    %c0_i32_0 = arith.constant 0 : i32
    return %c0_i32, %1 : i32, i32
  }
  func.func @transform_2(%arg0: i32, %arg1: i32) -> (i32, i32) {
    %c1_i32 = arith.constant 1 : i32
    %0 = arith.muli %arg0, %c1_i32 : i32
    %1 = arith.addi %0, %arg1 : i32
    %c0_i32 = arith.constant 0 : i32
    %c0_i32_0 = arith.constant 0 : i32
    return %c0_i32, %1 : i32, i32
  }
  func.func @transform_3(%arg0: i32, %arg1: i32) -> (i32, i32, i32) {
    %c0_i32 = arith.constant 0 : i32
    %c0_i32_0 = arith.constant 0 : i32
    %c0_i32_1 = arith.constant 0 : i32
    return %arg0, %c0_i32, %c0_i32_0 : i32, i32, i32
  }
  func.func @transform_4(%arg0: i32, %arg1: i32) -> (i32, i32, i32) {
    %c0_i32 = arith.constant 0 : i32
    %c0_i32_0 = arith.constant 0 : i32
    %c0_i32_1 = arith.constant 0 : i32
    return %arg0, %c0_i32, %c0_i32_0 : i32, i32, i32
  }
}

</mosaic_0001>

<bundles_post_ra>
// kernel: tpu_custom_call.1
= control target key start
LH: loop header
LB: loop body
LE: loop exit
PB: predicated region body
PF: predicated region fallthrough
CT: control target
= control target key end

     0   :  { %10 = vsyncpa [#allocation5], 0  ;;  %s340_s0 = inlined_call_operand.hbm [shape: s8[1,256], index: 0, kind: input, shape index: {}]   ;;  %s341_s1 = inlined_call_operand.hbm [shape: s8[2,256], index: 1, kind: input, shape index: {}]   ;;  %s342_s2 = inlined_call_operand.hbm [shape: f32[2,256], index: 2, kind: input, shape index: {}]   ;;  %s343_s3 = inlined_call_operand.vmem [shape: f32[1,2,1], index: 3, kind: output, shape index: {0}]   ;;  %s344_s4 = inlined_call_operand.vmem [shape: f32[1,2,1], index: 4, kind: output, shape index: {1}]  }
   0x1   :  { %11 = vsyncpa [#allocation7], 0  ;;  %s294_s15 = smov [#allocation6]   ;;  %s295_s17 = smov [#allocation4]  }
   0x2   :  { %s36_s16 = sshll.u32 %s294_s15, 4  ;;  %s22_s18 = sshll.u32 %s295_s17, 4  ;;  %s37_s16 = int_to_ptr.vmem [resolvable:$true] %s36_s16  ;;  %s23_s18 = int_to_ptr.vmem [resolvable:$true] %s22_s18 }
   0x3   :  { %s238_s19 = scalar_lea.vmem %s37_s16, 32  ;;  %p243_p1 = scmp.lt.s32.totalorder %s37_s16, %s37_s16 }
   0x4   :  { %p239_p0 = scmp.ne.s32.totalorder %s37_s16, %s238_s19  ;;  %p244_p2 = scmp.lt.s32.totalorder %s238_s19, %s238_s19 }
   0x6   :  { %p245_p3 = por %p244_p2, %p243_p1 }
   0x8   :  { %p246_p4 = pnand %p245_p3, %p239_p0 }
   0xa   :  { %249 = shalt.err (!%p246_p4)
}
   0xb   :  { %39 = dma.hbm_to_vmem [thread:$0]  %s341_s1, 32, %s37_s16, [#allocation7]  }
   0xc   :  { %s258_s22 = scalar_lea.vmem %s23_s18, 32  ;;  %p263_p6 = scmp.lt.s32.totalorder %s23_s18, %s23_s18 }
   0xd   :  { %p259_p5 = scmp.ne.s32.totalorder %s23_s18, %s258_s22  ;;  %p264_p7 = scmp.lt.s32.totalorder %s258_s22, %s258_s22 }
   0xf   :  { %p265_p8 = por %p264_p7, %p263_p6 }
  0x11   :  { %p266_p9 = pnand %p265_p8, %p259_p5 }
  0x13   :  { %269 = shalt.err (!%p266_p9)
}
  0x14   :  { %25 = dma.hbm_to_vmem [thread:$0]  %s340_s0, 32, %s23_s18, [#allocation5]  }
  0x15   :  { %s296_s25 = smov [#allocation8]  }
  0x16   :  { %s50_s26 = sshll.u32 %s296_s25, 4  ;;  %s51_s26 = int_to_ptr.vmem [resolvable:$true] %s50_s26 }
  0x17   :  { %s278_s27 = scalar_lea.vmem %s51_s26, 64  ;;  %p283_p11 = scmp.lt.s32.totalorder %s51_s26, %s51_s26 }
  0x18   :  { %p279_p10 = scmp.ne.s32.totalorder %s51_s26, %s278_s27  ;;  %p284_p12 = scmp.lt.s32.totalorder %s278_s27, %s278_s27 }
  0x1a   :  { %p285_p13 = por %p284_p12, %p283_p11 }
  0x1c   :  { %p286_p0 = pnand %p285_p13, %p279_p10 }
  0x1e   :  { %289 = shalt.err (!%p286_p0)
}
  0x1f   :  { %53 = dma.hbm_to_vmem [thread:$0]  %s342_s2, 64, %s51_s26, [#allocation7]  }
  0x20   :  { %290 = dma.done.wait [#allocation5], 32  }
  0x21   :  { %291 = vsyncadd [#allocation5], 4294967264 }
  0x22   :  { %292 = dma.done.wait [#allocation7], 96  }
  0x23   :  { %293 = vsyncadd [#allocation7], 4294967200  ;;  %v82_v0 = vlaneseq  ;;  %v297_v1 = vmov inf   ;;  %v298_v2 = vmov -inf   ;;  %v75_v4 = vld [vmem:[#allocation4] sm:$0x3] }
  0x24   :  { %73 = vst [vmem:[#allocation2] sm:$0xf] %v297_v1  ;;  %74 = vst [vmem:[#allocation3] sm:$0xf] %v298_v2  ;;  %v78_v5 = vld [vmem:[#allocation6] sm:$0x3]  ;;  %v76_v8 = vunpack.c.0.s8 %v75_v4 }
  0x25   :  { %v83_v3 = vshrl.u32 %v82_v0, 7  ;;  %v299_v6 = vmov 1983009808   ;;  %v79_v9 = vunpack.c.0.s8 %v78_v5  ;;  %v105_v24 = vld [vmem:[#allocation8] sm:$0xf]  ;;  %vm186_vm0 = vcmask 1041408  }
  0x26   :  { %v110_v7 = vunpack.c.l.s4 %v299_v6  ;;  %v77_v12 = vcvt.s32.f32 %v76_v8  ;;  %vm192_vm1 = vcmask 1024  }
  0x27   :  { %v84_v10 = vsub.s32 0, %v83_v3  ;;  %v88_v11 = vsub.s32 4, %v83_v3  ;;  %v80_v13 = vcvt.s32.f32 %v79_v9 }
  0x28   :  { %v111_v17 = vunpack.c.0.s8 %v110_v7 }
  0x29   :  { %v85_v14 = vrot.slane %v77_v12, %v84_v10  ;;  %v89_v15 = vrot.slane %v77_v12, %v88_v11  ;;  %v101_v16 = vcombine.high %v80_v13, %v80_v13 }
  0x2a   :  { %v114_v22 = vsub.s32 %v111_v17, %v83_v3 }
  0x2b   :  { %v95_v18 = vrot.slane %v85_v14, %v84_v10  ;;  %v99_v19 = vrot.slane %v89_v15, %v84_v10  ;;  %v128_v30 = vld [vmem:[#allocation2] sm:$0xf]  ;;  %v155_v31 = vld [vmem:[#allocation3] sm:$0xf] }
  0x2d   :  { %v103_v20 = vmul.f32 %v95_v18, %v80_v13  ;;  %v104_v21 = vmul.f32 %v101_v16, %v99_v19 }
  0x2f   :  { %v108_v23 = vcombine.low %v103_v20, %v104_v21 }
  0x31   :  { %v115_v25 = vrot.slane %v108_v23, %v114_v22 }
  0x33   :  { %v117_v26 = vmul.f32 %v115_v25, %v105_v24 }
  0x35   :  { %v136_v27 = vrot.slane %v117_v26, %v114_v22 }
  0x37   :  { %v137_v28 = vcombine.high %v136_v27, %v136_v27 }
  0x39   :  { %v144_v29 = vcombine.low %v136_v27, %v137_v28 }
  0x3b   :  { %v151_v32 = vrot.slane %v144_v29, %v114_v22 }
  0x3d   :  { %v153_v33 = vmin.f32 %v128_v30, %v151_v32  ;;  %v169_v34 = vmax.f32 %v155_v31, %v151_v32 }
  0x3f   :  { %154 = vst [vmem:[#allocation2] sm:$0xf] %v153_v33  ;;  %170 = vst [vmem:[#allocation3] sm:$0xf] %v169_v34 }
  0x46   :  { %v222_v35 = vld.sshfl [vmem:[#allocation2] sm:$0x33 pattern:$0x76325410] }
  0x47   :  { %v183_v36 = vcombine.high %v222_v35, %v222_v35  ;;  %v187_v37 = vsel %vm186_vm0, %v222_v35, inf  ;;  %v223_v38 = vld.sshfl [vmem:[#allocation3] sm:$0x33 pattern:$0x76325410] }
  0x48   :  { %v203_v39 = vcombine.high %v223_v38, %v223_v38  ;;  %v206_v41 = vsel %vm186_vm0, %v223_v38, -inf }
  0x49   :  { %v188_v40 = vsel %vm186_vm0, %v183_v36, inf }
  0x4a   :  { %v189_v42 = vmin.f32 %v187_v37, %v188_v40  ;;  %v207_v43 = vsel %vm186_vm0, %v203_v39, -inf }
  0x4b   :  { %v208_v44 = vmax.f32 %v206_v41, %v207_v43 }
  0x4c   :  { %190 = vmin.xlane.f32.xlu0 %v189_v42 }
  0x50   :  { %209 = vmax.xlane.f32.xlu0 %v208_v44 }
  0xd5   :  { %v191_v45 = vpop.xlane.xlu0 %190 }
  0xd6   :  { %193 = vst.msk [vmem:[%s343_s3] sm:$0x3] %vm192_vm1, %v191_v45 }
  0xd9   :  { %v210_v46 = vpop.xlane.xlu0 %209 }
  0xda   :  { %211 = vst.msk [vmem:[%s344_s4] sm:$0x3] %vm192_vm1, %v210_v46 }
  0xdb   :  { %220 = vsyncpa [#allocation5], 1 }
  0xdc   :  { %221 = vsyncpa [#allocation7], 1 }

</bundles_post_ra>
